<compile_context>
chip_gen: v7x
topology: tpu7x:2x2x1
jax: 0.10.0
libtpu: 0.0.40
codegen_flags: <defaults>
</compile_context>

<pallas_src>
import jax
import jax.numpy as jnp
from jax import lax
from jax.experimental import pallas as pl
from jax.experimental.pallas import tpu as pltpu

IN_FEATURES = 273
HIDDEN = 128
OUT_FEATURES = 1


def _round_up(v, m):
    return ((v + m - 1) // m) * m


def vanilla_net_kernel(x_ref, w1_ref, b1_ref, w2_ref, b2_ref, o_ref):
    # fc1 on the MXU (f32 accumulate), bias + ReLU in f32 on the VPU.
    h = jnp.dot(x_ref[...], w1_ref[...], preferred_element_type=jnp.float32)
    h = jnp.maximum(h + b1_ref[...], 0.0)                       # (tile, 128) f32
    # fc2 (single output feature) as w2 @ h^T -> (1, tile): the q @ k^T
    # contraction pattern, so the output is produced already lane-dense and
    # stored with one unmasked row store per tile.
    y = lax.dot_general(
        w2_ref[...], h,
        dimension_numbers=(((1,), (1,)), ((), ())),
        preferred_element_type=jnp.float32)                     # (1, tile)
    # b2 is a single scalar living in SMEM.
    o_ref[...] = (y + b2_ref[0, 0]).astype(o_ref.dtype)


def _choose_tile(batch, max_tile):
    # A block equal to the full array dim is always legal -> small batches run
    # as one tile with zero padding waste and no divisibility concerns.
    if batch <= 256:
        return batch
    # Larger batches: fixed tiles, multiple of 128 (aligned sublanes for
    # f32/bf16 x blocks and a legal lane-dense output block), aiming for >= 4
    # grid steps (pipeline overlap + v7x 2-TC split), capped at 1024 rows so
    # the double-buffered x tile stays well inside v5e's 16 MiB scoped VMEM.
    tile = _round_up(pl.cdiv(batch, 4), 128)
    return max(128, min(max_tile, tile))


def vanilla_net_forward(x, w1, b1, w2, b2, *, max_tile=1024):
    """y = fc2(relu(fc1(x))).

    x:  (..., 273)  - fed to the kernel as-is (no wrapper cast / pad copies);
                      pass bf16 x for the HBM-bandwidth win, f32 for
                      bit-faithful nn.Linear-style inference.
    w1: (273, 128)  - fc1.weight transposed
    b1: (1, 128)
    w2: (1, 128)    - fc2.weight (single output row)
    b2: (1, 1)
    returns (..., 1) float32
    """
    lead_shape = x.shape[:-1]
    x2 = x.reshape(-1, IN_FEATURES)
    batch = x2.shape[0]

    tile = _choose_tile(batch, max_tile)
    num_tiles = pl.cdiv(batch, tile)
    total = num_tiles * tile

    # Match w1's dtype to x so the MXU sees a homogeneous matmul; w1 is only
    # 273x128 so this cast is negligible.  b1 / w2 / b2 stay f32.
    w1 = w1.astype(x2.dtype)

    itemsize = jnp.dtype(x2.dtype).itemsize
    cost = pl.CostEstimate(
        flops=2 * total * IN_FEATURES * HIDDEN + 2 * total * HIDDEN,
        transcendentals=0,
        bytes_accessed=(total * IN_FEATURES * itemsize          # x (dominant)
                        + IN_FEATURES * HIDDEN * itemsize       # w1
                        + (2 * HIDDEN + 1) * 4                  # b1, w2, b2
                        + total * 4),                           # output
    )

    out = pl.pallas_call(
        vanilla_net_kernel,
        out_shape=jax.ShapeDtypeStruct((num_tiles, tile), jnp.float32),
        grid=(num_tiles,),
        in_specs=[
            # Activation tile: streamed, double-buffered per grid step.  The
            # grid is cdiv(batch, tile); the ragged last block is bounds-
            # handled by Pallas (garbage tail rows -> garbage tail outputs
            # that the wrapper slices off), so x is never padded in HBM.
            pl.BlockSpec((tile, IN_FEATURES), lambda i: (i, 0)),
            # Weights / bias: constant index_map -> stay VMEM-resident.
            pl.BlockSpec((IN_FEATURES, HIDDEN), lambda i: (0, 0)),
            pl.BlockSpec((1, HIDDEN), lambda i: (0, 0)),
            pl.BlockSpec((1, HIDDEN), lambda i: (0, 0)),
            # b2 scalar in SMEM (avoids a padded (8,128) VMEM tile for 4 B).
            pl.BlockSpec(memory_space=pltpu.MemorySpace.SMEM),
        ],
        # Lane-dense output: one (1, tile) row per grid step.
        out_specs=pl.BlockSpec((1, tile), lambda i: (i, 0)),
        compiler_params=pltpu.CompilerParams(
            # Batch tiles are independent -> shard across v7x's 2 TensorCores
            # (harmless no-op on v5e/v6e).
            dimension_semantics=("parallel",),
        ),
        cost_estimate=cost,
    )(x2, w1, b1, w2, b2)

    y = out.reshape(-1)[:batch]
    return y.reshape(lead_shape + (OUT_FEATURES,))


def init_params(key):
    """Deterministic init mimicking nn.Linear's U(-1/sqrt(fan_in), 1/sqrt(fan_in))."""
    k1, k2, k3, k4 = jax.random.split(key, 4)
    bound1 = 1.0 / (IN_FEATURES ** 0.5)
    bound2 = 1.0 / (HIDDEN ** 0.5)
    w1 = jax.random.uniform(k1, (IN_FEATURES, HIDDEN), jnp.float32, -bound1, bound1)
    b1 = jax.random.uniform(k2, (1, HIDDEN), jnp.float32, -bound1, bound1)
    w2 = jax.random.uniform(k3, (OUT_FEATURES, HIDDEN), jnp.float32, -bound2, bound2)
    b2 = jax.random.uniform(k4, (OUT_FEATURES, OUT_FEATURES), jnp.float32, -bound2, bound2)
    return w1, b1, w2, b2


if __name__ == "__main__":
    key = jax.random.PRNGKey(0)
    kx, kx2, kp = jax.random.split(key, 3)
    w1, b1, w2, b2 = init_params(kp)

    # Small single-tile case (module semantics: (B, 273) -> (B, 1), f32).
    batch = 8
    x = jax.random.normal(kx, (batch, IN_FEATURES), jnp.float32)
    out = jax.block_until_ready(vanilla_net_forward(x, w1, b1, w2, b2))
    assert out.shape == (batch, OUT_FEATURES)
    ref = jnp.maximum(x @ w1 + b1, 0.0) @ w2.T + b2
    assert jnp.allclose(out, ref, atol=2e-2, rtol=2e-2), (out, ref)

    # Multi-tile case with a ragged last block (exercises the streamed path).
    batch2 = 600
    xb = jax.random.normal(kx2, (batch2, IN_FEATURES), jnp.float32)
    out2 = jax.block_until_ready(vanilla_net_forward(xb, w1, b1, w2, b2))
    assert out2.shape == (batch2, OUT_FEATURES)
    ref2 = jnp.maximum(xb @ w1 + b1, 0.0) @ w2.T + b2
    assert jnp.allclose(out2, ref2, atol=2e-2, rtol=2e-2), (out2, ref2)

    print("KERNEL_OK")
</pallas_src>

<mosaic_0001>
module attributes {stable_mosaic.version = 11 : i64} {
  func.func @vanilla_net_kernel(%arg0: i32, %arg1: memref<8x273xf32, #tpu.memory_space<vmem>>, %arg2: memref<273x128xf32, #tpu.memory_space<vmem>>, %arg3: memref<1x128xf32, #tpu.memory_space<vmem>>, %arg4: memref<1x128xf32, #tpu.memory_space<vmem>>, %arg5: memref<1x1xf32, #tpu.memory_space<smem>>, %arg6: memref<1x8xf32, #tpu.memory_space<vmem>>) attributes {dimension_semantics = [#tpu.dimension_semantics<parallel>], iteration_bounds = array<i64: 1>, scalar_prefetch = 0 : i64, scratch_operands = 0 : i64, tpu.core_type = #tpu.core_type<tc>, window_params = [{transform_indices = @transform_0, window_bounds = array<i64: 8, 273>}, {pipeline_mode = #tpu.pipeline_mode<synchronous>, transform_indices = @transform_1, window_bounds = array<i64: 273, 128>}, {pipeline_mode = #tpu.pipeline_mode<synchronous>, transform_indices = @transform_2, window_bounds = array<i64: 1, 128>}, {pipeline_mode = #tpu.pipeline_mode<synchronous>, transform_indices = @transform_3, window_bounds = array<i64: 1, 128>}, {transform_indices = @transform_4, window_bounds = array<i64: 1, 1>}, {transform_indices = @transform_5, window_bounds = array<i64: 1, 8>}]} {
    %c0 = arith.constant 0 : index
    %c0_0 = arith.constant 0 : index
    %0 = vector.load %arg1[%c0, %c0_0] : memref<8x273xf32, #tpu.memory_space<vmem>>, vector<8x273xf32>
    %c0_1 = arith.constant 0 : index
    %c0_2 = arith.constant 0 : index
    %1 = vector.load %arg2[%c0_1, %c0_2] : memref<273x128xf32, #tpu.memory_space<vmem>>, vector<273x128xf32>
    %cst = arith.constant dense<0.000000e+00> : vector<8x128xf32>
    %2 = tpu.matmul %0, %1, %cst {dimension_numbers = #tpu.dot_dimension_numbers<[1], [0], [0], [1], [0, 0, 1, 1], [], []>} : vector<8x273xf32>, vector<273x128xf32>, vector<8x128xf32> -> vector<8x128xf32>
    %c0_3 = arith.constant 0 : index
    %c0_4 = arith.constant 0 : index
    %3 = vector.load %arg3[%c0_3, %c0_4] : memref<1x128xf32, #tpu.memory_space<vmem>>, vector<1x128xf32>
    %4 = vector.broadcast %3 : vector<1x128xf32> to vector<8x128xf32>
    %5 = arith.addf %2, %4 : vector<8x128xf32>
    %cst_5 = arith.constant 0.000000e+00 : f32
    %6 = vector.broadcast %cst_5 : f32 to vector<8x128xf32>
    %7 = arith.maximumf %5, %6 : vector<8x128xf32>
    %c0_6 = arith.constant 0 : index
    %c0_7 = arith.constant 0 : index
    %8 = vector.load %arg4[%c0_6, %c0_7] : memref<1x128xf32, #tpu.memory_space<vmem>>, vector<1x128xf32>
    %cst_8 = arith.constant dense<0.000000e+00> : vector<1x8xf32>
    %9 = tpu.matmul %8, %7, %cst_8 {dimension_numbers = #tpu.dot_dimension_numbers<[1], [1], [0], [0], [0, 0, 1, 0], [], []>} : vector<1x128xf32>, vector<8x128xf32>, vector<1x8xf32> -> vector<1x8xf32>
    %c0_9 = arith.constant 0 : index
    %c0_10 = arith.constant 0 : index
    %10 = memref.load %arg5[%c0_9, %c0_10] : memref<1x1xf32, #tpu.memory_space<smem>>
    %11 = vector.broadcast %10 : f32 to vector<1x8xf32>
    %12 = arith.addf %9, %11 : vector<1x8xf32>
    %c0_11 = arith.constant 0 : index
    %c0_12 = arith.constant 0 : index
    %13 = vector.load %arg6[%c0_11, %c0_12] : memref<1x8xf32, #tpu.memory_space<vmem>>, vector<1x8xf32>
    tpu.vector_store %arg6[%c0_11, %c0_12], %12 {strides = array<i32>} : memref<1x8xf32, #tpu.memory_space<vmem>>, vector<1x8xf32>,
    return
  }
  func.func @transform_0(%arg0: i32) -> (i32, i32) {
    %c0_i32 = arith.constant 0 : i32
    %c0_i32_0 = arith.constant 0 : i32
    return %arg0, %c0_i32 : i32, i32
  }
  func.func @transform_1(%arg0: i32) -> (i32, i32) {
    %c0_i32 = arith.constant 0 : i32
    %c0_i32_0 = arith.constant 0 : i32
    %c0_i32_1 = arith.constant 0 : i32
    return %c0_i32, %c0_i32_0 : i32, i32
  }
  func.func @transform_2(%arg0: i32) -> (i32, i32) {
    %c0_i32 = arith.constant 0 : i32
    %c0_i32_0 = arith.constant 0 : i32
    %c0_i32_1 = arith.constant 0 : i32
    return %c0_i32, %c0_i32_0 : i32, i32
  }
  func.func @transform_3(%arg0: i32) -> (i32, i32) {
    %c0_i32 = arith.constant 0 : i32
    %c0_i32_0 = arith.constant 0 : i32
    %c0_i32_1 = arith.constant 0 : i32
    return %c0_i32, %c0_i32_0 : i32, i32
  }
  func.func @transform_4(%arg0: i32) -> (i32, i32) {
    %c0_i32 = arith.constant 0 : i32
    %c0_i32_0 = arith.constant 0 : i32
    %c0_i32_1 = arith.constant 0 : i32
    return %c0_i32, %c0_i32_0 : i32, i32
  }
  func.func @transform_5(%arg0: i32) -> (i32, i32) {
    %c0_i32 = arith.constant 0 : i32
    %c0_i32_0 = arith.constant 0 : i32
    return %arg0, %c0_i32 : i32, i32
  }
}

</mosaic_0001>

<bundles_post_ra>
// kernel: tpu_custom_call.1
= control target key start
LH: loop header
LB: loop body
LE: loop exit
PB: predicated region body
PF: predicated region fallthrough
CT: control target
= control target key end

     0   :  { %11 = vsyncpa [#allocation4], 0  ;;  %s602_s0 = inlined_call_operand.hbm [shape: f32[8,273], index: 0, kind: input, shape index: {}]   ;;  %s603_s1 = inlined_call_operand.hbm [shape: f32[273,128], index: 1, kind: input, shape index: {}]   ;;  %s604_s2 = inlined_call_operand.vmem [shape: f32[1,128], index: 2, kind: input, shape index: {}]   ;;  %s605_s3 = inlined_call_operand.vmem [shape: f32[1,128], index: 3, kind: input, shape index: {}]   ;;  %s606_s4 = inlined_call_operand.<no memory space> [shape: f32[1,1], index: 4, kind: input, shape index: {}]   ;;  %s607_s5 = inlined_call_operand.hbm [shape: f32[1,8], index: 5, kind: output, shape index: {}]  }
   0x1   :  { %12 = vsyncpa [#allocation7], 0 }
   0x2   :  { %13 = vsyncpa [#allocation5], 0  ;;  %s506_s18 = smov [#allocation3]   ;;  %s507_s20 = smov [#allocation6]  }
   0x3   :  { %s20_s19 = sshll.u32 %s506_s18, 4  ;;  %s29_s21 = sshll.u32 %s507_s20, 4  ;;  %s21_s19 = int_to_ptr.vmem [resolvable:$true] %s20_s19  ;;  %s544_s21 = int_to_ptr.vmem [resolvable:$true] %s29_s21 }
   0x4   :  { %s434_s24 = scalar_lea.hbm %s602_s0, 384 }
   0x5   :  { %p435_p0 = scmp.ne.s32.totalorder %s602_s0, %s434_s24  ;;  %p438_p1 = scmp.lt.u32.totalorder %s434_s24, %s602_s0 }
   0x7   :  { %p440_p2 = pnand %p438_p1, %p435_p0 }
   0x9   :  { %443 = shalt.err (!%p440_p2)
}
   0xa   :  { %s444_s29 = scalar_lea.vmem %s21_s19, 384  ;;  %p449_p4 = scmp.lt.s32.totalorder %s21_s19, %s21_s19 }
   0xb   :  { %p445_p3 = scmp.ne.s32.totalorder %s21_s19, %s444_s29  ;;  %p450_p5 = scmp.lt.s32.totalorder %s444_s29, %s444_s29 }
   0xd   :  { %p451_p6 = por %p450_p5, %p449_p4 }
   0xf   :  { %p452_p7 = pnand %p451_p6, %p445_p3 }
  0x11   :  { %455 = shalt.err (!%p452_p7)
}
  0x12   :  { %23 = dma.hbm_to_vmem [thread:$0]  %s602_s0, 384, %s21_s19, [#allocation4]  }
  0x13   :  { %s456_s9 = scalar_lea.hbm %s603_s1, 4480 }
  0x14   :  { %p457_p8 = scmp.ne.s32.totalorder %s603_s1, %s456_s9  ;;  %p460_p9 = scmp.lt.u32.totalorder %s456_s9, %s603_s1 }
  0x16   :  { %p462_p10 = pnand %p460_p9, %p457_p8 }
  0x18   :  { %465 = shalt.err (!%p462_p10)
}
  0x19   :  { %s466_s14 = scalar_lea.vmem %s544_s21, 4480  ;;  %p471_p12 = scmp.lt.s32.totalorder %s544_s21, %s544_s21 }
  0x1a   :  { %p467_p11 = scmp.ne.s32.totalorder %s544_s21, %s466_s14  ;;  %p472_p13 = scmp.lt.s32.totalorder %s466_s14, %s466_s14 }
  0x1c   :  { %p473_p0 = por %p472_p13, %p471_p12 }
  0x1e   :  { %p474_p1 = pnand %p473_p0, %p467_p11 }
  0x20   :  { %477 = shalt.err (!%p474_p1)
}
  0x21   :  { %s508_s0 = smov 128   ;;  %s509_s15 = smov 8  }
  0x22   :  { %35 = dma.hbm_to_vmem [thread:$0]  %s603_s1, 4480, %s544_s21, [#allocation7], %s508_s0, %s508_s0, %s509_s15  }
  0x23   :  { %500 = dma.done.wait [#allocation4], 384  }
  0x24   :  { %501 = vsyncadd [#allocation4], 4294966912 }
  0x25   :  { %502 = dma.done.wait [#allocation7], 4480  }
  0x26   :  { %503 = vsyncadd [#allocation7], 4294962816  ;;  %v510_v0 = vmov 0.0|0.0   ;;  %vm511_vm0 = vmmov 0   ;;  %v512_v1 = vmov 0.0   ;;  %v67_v2 = vld [vmem:[#allocation6 + $0x80] sm:$0xff] }
  0x27   :  { %423 = vmatprep.subr.bf16.mxu1 %v510_v0  ;;  %383 = vmatprep.mubr.msk.f32.mxu1 %vm511_vm0, %v512_v1  ;;  %v68_v3 = vld [vmem:[#allocation6 + $0x88] sm:$0xff]  ;;  %v51_v4 = vld [vmem:[#allocation6] sm:$0xff]  ;;  %v69_v7 = vld [vmem:[#allocation6 + $0x90] sm:$0xff]  ;;  %vm97_vm1 = vcmask 1040384   ;;  %vm93_vm2 = vcmask 138240   ;;  %s513_s23 = smov [#allocation8]  }
  0x28   :  { %v391_v5 = vpack.c.bf16 %v68_v3, %v67_v2  ;;  %v52_v6 = vld [vmem:[#allocation6 + $0x8] sm:$0xff]  ;;  %v70_v8 = vld [vmem:[#allocation6 + $0x98] sm:$0xff]  ;;  %v53_v11 = vld [vmem:[#allocation6 + $0x10] sm:$0xff]  ;;  %v244_v3 = vstv %s606_s4  ;;  %s323_s24 = sshll.u32 %s513_s23, 4  ;;  %vm315_vm3 = vcmask 57344   ;;  %s324_s24 = int_to_ptr.vmem [resolvable:$true] %s323_s24 }
  0x29   :  { %v393_v9 = vpack.c.bf16 %v52_v6, %v51_v4  ;;  %v395_v10 = vpack.c.bf16 %v70_v8, %v69_v7  ;;  %v54_v12 = vld [vmem:[#allocation6 + $0x18] sm:$0xff]  ;;  %v71_v13 = vld [vmem:[#allocation6 + $0xa0] sm:$0xff]  ;;  %v72_v14 = vld [vmem:[#allocation6 + $0xa8] sm:$0xff]  ;;  %s482_s25 = scalar_lea.vmem %s324_s24, 32  ;;  %p483_p3 = scmp.lt.s32.totalorder %s324_s24, %s324_s24 }
  0x2a   :  { %392 = vmatprep.subr.bf16.mxu0 %v391_v5  ;;  %v397_v15 = vpack.c.bf16 %v54_v12, %v53_v11  ;;  %v399_v16 = vpack.c.bf16 %v72_v14, %v71_v13  ;;  %v55_v17 = vld [vmem:[#allocation6 + $0x20] sm:$0xff]  ;;  %v56_v18 = vld [vmem:[#allocation6 + $0x28] sm:$0xff]  ;;  %v73_v19 = vld [vmem:[#allocation6 + $0xb0] sm:$0xff] }
  0x2b   :  { %394 = vmatpush3.bf16.msra.mxu0 %v393_v9  ;;  %v74_v20 = vld [vmem:[#allocation6 + $0xb8] sm:$0xff]  ;;  %v401_v21 = vpack.c.bf16 %v56_v18, %v55_v17  ;;  %v57_v23 = vld [vmem:[#allocation6 + $0x30] sm:$0xff]  ;;  %v75_v25 = vld [vmem:[#allocation6 + $0xc0] sm:$0xff] }
  0x2c   :  { %396 = vmatprep.subr.bf16.mxu0 %v395_v10  ;;  %v403_v22 = vpack.c.bf16 %v74_v20, %v73_v19  ;;  %v58_v24 = vld [vmem:[#allocation6 + $0x38] sm:$0xff]  ;;  %v76_v26 = vld [vmem:[#allocation6 + $0xc8] sm:$0xff]  ;;  %v49_v27 = vld [vmem:[#allocation3 + $0x8] sm:$0xff] }
  0x2d   :  { %165 = vmatprep.mubr.f32.mxu0 %v49_v27  ;;  %v83_v28 = vld [vmem:[#allocation6 + $0x100] sm:$0xff]  ;;  %v84_v29 = vld [vmem:[#allocation6 + $0x108] sm:$0xff]  ;;  %v405_v30 = vpack.c.bf16 %v58_v24, %v57_v23  ;;  %v407_v32 = vpack.c.bf16 %v76_v26, %v75_v25  ;;  %v77_v35 = vld [vmem:[#allocation6 + $0xd0] sm:$0xff] }
  0x2e   :  { %v424_v31 = vpack.c.bf16 %v84_v29, %v83_v28  ;;  %v59_v33 = vld [vmem:[#allocation6 + $0x40] sm:$0xff]  ;;  %v60_v34 = vld [vmem:[#allocation6 + $0x48] sm:$0xff]  ;;  %v78_v36 = vld [vmem:[#allocation6 + $0xd8] sm:$0xff] }
  0x2f   :  { %398 = vmatpush3.bf16.msra.mxu0 %v397_v15  ;;  %v85_v37 = vld [vmem:[#allocation6 + $0x110] sm:$0x1]  ;;  %v409_v38 = vpack.c.bf16 %v60_v34, %v59_v33  ;;  %v50_v39 = vld [vmem:[#allocation3 + $0x10] sm:$0xff]  ;;  %v411_v40 = vpack.c.bf16 %v78_v36, %v77_v35  ;;  %v79_v43 = vld [vmem:[#allocation6 + $0xe0] sm:$0xff] }
  0x30   :  { %400 = vmatprep.subr.bf16.mxu0 %v399_v16  ;;  %425 = vmatpush3.bf16.msra.mxu1 %v424_v31  ;;  %v61_v41 = vld [vmem:[#allocation6 + $0x50] sm:$0xff]  ;;  %v62_v42 = vld [vmem:[#allocation6 + $0x58] sm:$0xff]  ;;  %v80_v44 = vld [vmem:[#allocation6 + $0xe8] sm:$0xff] }
  0x31   :  { %381 = vmatprep.subr.mxu1 %v512_v1  ;;  %v413_v45 = vpack.c.bf16 %v62_v42, %v61_v41  ;;  %v415_v46 = vpack.c.bf16 %v80_v44, %v79_v43  ;;  %v63_v47 = vld [vmem:[#allocation6 + $0x60] sm:$0xff]  ;;  %v64_v48 = vld [vmem:[#allocation6 + $0x68] sm:$0xff]  ;;  %v81_v49 = vld [vmem:[#allocation6 + $0xf0] sm:$0xff] }
  0x32   :  { %v82_v50 = vld [vmem:[#allocation6 + $0xf8] sm:$0xff]  ;;  %v417_v51 = vpack.c.bf16 %v64_v48, %v63_v47  ;;  %v65_v53 = vld [vmem:[#allocation6 + $0x70] sm:$0xff]  ;;  %v48_v56 = vld [vmem:[#allocation3] sm:$0xff] }
  0x33   :  { %402 = vmatpush3.bf16.msra.mxu0 %v401_v21  ;;  %v419_v52 = vpack.c.bf16 %v82_v50, %v81_v49  ;;  %v66_v54 = vld [vmem:[#allocation6 + $0x78] sm:$0xff]  ;;  %v333_v61 = vld [vmem:[%s604_s2] ss:$0 sm:$0xff]  ;;  %s478_s2 = scalar_lea.vmem %s324_s24, 16 }
  0x34   :  { %404 = vmatprep.subr.bf16.mxu0 %v403_v22  ;;  %382 = vmatpush3.msk.msra.mxu1 %vm97_vm1, %v85_v37  ;;  %v421_v55 = vpack.c.bf16 %v66_v54, %v65_v53  ;;  %v242_v2 = vld [vmem:[%s605_s3] sm:$0x1]  ;;  %p479_p2 = scmp.ne.s32.totalorder %s324_s24, %s478_s2  ;;  %p484_p4 = scmp.lt.s32.totalorder %s482_s25, %s478_s2 }
  0x35   :  { %384 = vmatmul.mubr.msk.f32.vlgmr.msra.gmra.mrb[0].mxu1 %vm93_vm2, %v50_v39  ;;  %386 = vmatprep.subr.mxu1 %v512_v1 }
  0x36   :  { %388 = vmatprep.mubr.msk.f32.mxu1 %vm511_vm0, %v512_v1  ;;  %p485_p5 = por %p484_p4, %p483_p3 }
  0x37   :  { %406 = vmatpush3.bf16.msra.mxu0 %v405_v30 }
  0x38   :  { %408 = vmatprep.subr.bf16.mxu0 %v407_v32  ;;  %p486_p6 = pnand %p485_p5, %p479_p2 }
  0x3b   :  { %410 = vmatpush3.bf16.msra.mxu0 %v409_v38 }
  0x3c   :  { %412 = vmatprep.subr.bf16.mxu0 %v411_v40 }
  0x3f   :  { %414 = vmatpush3.bf16.msra.mxu0 %v413_v45 }
  0x40   :  { %416 = vmatprep.subr.bf16.mxu0 %v415_v46 }
  0x43   :  { %418 = vmatpush3.bf16.msra.mxu0 %v417_v51 }
  0x44   :  { %420 = vmatprep.subr.bf16.mxu0 %v419_v52 }
  0x47   :  { %422 = vmatpush3.bf16.msra.mxu0 %v421_v55 }
  0x4a   :  { %166 = vmatmul.mubr.f32.vlgmr.msra.gmra.mrb[0].mxu0 %v48_v56 }
 0x108   :  { %v237_v57 = vpop.f32.mrb[0].mxu1 }
 0x109   :  { %v385_v58 = vpop.f32.mrb[1].mxu1 }
 0x11d   :  { %v368_v59 = vpop.f32.mrb[0].mxu0 }
 0x11e   :  { %v369_v60 = vpop.f32.mrb[1].mxu0 }
 0x11f   :  { %v370_v62 = vadd.f32 %v369_v60, %v368_v59 }
 0x121   :  { %v168_v63 = vadd.f32 %v370_v62, %v333_v61 }
 0x123   :  { %v238_v0 = vadd.f32 %v237_v57, %v168_v63 }
 0x125   :  { %v241_v1 = vmax.f32 %v238_v0, 0.0 }
 0x127   :  { %387 = vmatpush3.xpose.msra.mxu1 %v241_v1 }
 0x12a   :  { %389 = vmatmul.mubr.f32.vlgmr.msra.gmra.mrb[2].mxu1 %v242_v2 }
 0x1fd   :  { %v311_v4 = vpop.f32.mrb[2].mxu1 }
 0x1fe   :  { %v312_v5 = vadd.f32 %v311_v4, %v244_v3  ;;  %v390_v6 = vpop.f32.mrb[3].mxu1 }
 0x200   :  { %316 = vst.msk [vmem:[#allocation8] sm:$0x1] %vm315_vm3, %v312_v5 }
 0x201   :  { %489 = shalt.err (!%p486_p6)
}
 0x202   :  { %s490_s4 = scalar_lea.hbm %s607_s5, 16 }
 0x203   :  { %p491_p7 = scmp.ne.s32.totalorder %s607_s5, %s490_s4  ;;  %p494_p8 = scmp.lt.u32.totalorder %s490_s4, %s607_s5 }
 0x205   :  { %p496_p9 = pnand %p494_p8, %p491_p7 }
 0x207   :  { %499 = shalt.err (!%p496_p9)
}
 0x208   :  { %326 = dma.vmem_to_hbm [thread:$0]  %s324_s24, 16, %s607_s5, [#allocation5]  }
 0x209   :  { %504 = dma.done.wait [#allocation5], 16  }
 0x20a   :  { %505 = vsyncadd [#allocation5], 4294967280 }
 0x20b   :  { %330 = vsyncpa [#allocation4], 1 }
 0x20c   :  { %331 = vsyncpa [#allocation7], 1 }
 0x20d   :  { %332 = vsyncpa [#allocation5], 1 }

</bundles_post_ra>
